<compile_context>
chip_gen: v5e
topology: v5e:2x2
jax: 0.10.0
libtpu: 0.0.40
codegen_flags: <defaults>
</compile_context>

<pallas_src>
import jax
import jax.numpy as jnp
from jax.experimental import pallas as pl
from jax.experimental.pallas import tpu as pltpu


def _critic_kernel(s_ref, a_ref, w1s_ref, w1a_ref, w2_ref, w3_ref, b_ref, q_ref):
    # ---- layer 1 (concat-free): cat([s, a]) @ W1 == s @ W1_s + a @ W1_a ----
    h = (jnp.dot(s_ref[...], w1s_ref[...], preferred_element_type=jnp.float32)
         + jnp.dot(a_ref[...], w1a_ref[...], preferred_element_type=jnp.float32)
         + b_ref[0:1, :])
    h = jnp.maximum(h, 0.0)

    # ---- layer 2 (block-diagonal (2H, 2H): both heads in one MXU pass) ----
    h = jnp.dot(h, w2_ref[...], preferred_element_type=jnp.float32) + b_ref[1:2, :]
    h = jnp.maximum(h, 0.0)

    # ---- layer 3 (block-diagonal (2H, 2)) -> column 0 = q1, column 1 = q2 ----
    q = jnp.dot(h, w3_ref[...], preferred_element_type=jnp.float32) + b_ref[2:3, 0:2]
    q_ref[...] = q.astype(q_ref.dtype)


@jax.jit
def critic_forward(state, action, packed):
    """Pallas equivalent of Critic.forward -> (q1, q2), each (B, 1)."""
    B = state.shape[0]
    args = (
        state.astype(jnp.float32),
        action.astype(jnp.float32),
        packed["w1s"],   # (num_inputs, 2H)  f32
        packed["w1a"],   # (num_actions, 2H) f32
        packed["w2"],    # (2H, 2H)          f32, block-diagonal
        packed["w3"],    # (2H, 2)           f32, block-diagonal
        packed["b"],     # (3, 2H)           f32  (b1 | b2 | [b3, 0...])
    )
    q = pl.pallas_call(
        _critic_kernel,
        out_shape=jax.ShapeDtypeStruct((B, 2), jnp.float32),
        in_specs=[pl.BlockSpec(memory_space=pltpu.VMEM) for _ in args],
        out_specs=pl.BlockSpec(memory_space=pltpu.VMEM),
    )(*args)
    return q[:, 0:1], q[:, 1:2]


def init_critic_params(key, num_inputs, num_actions, hidden_size):
    """PyTorch nn.Linear-style init: U(-1/sqrt(fan_in), 1/sqrt(fan_in)).
    Logical (per-layer) params, weights stored as (in, out)."""
    d_in = num_inputs + num_actions

    def linear(k, fan_in, fan_out):
        kw, kb = jax.random.split(k)
        bound = 1.0 / jnp.sqrt(fan_in)
        w = jax.random.uniform(kw, (fan_in, fan_out), jnp.float32, -bound, bound)
        b = jax.random.uniform(kb, (1, fan_out), jnp.float32, -bound, bound)
        return w, b

    keys = jax.random.split(key, 6)
    params = {}
    params["w1_1"], params["b1_1"] = linear(keys[0], d_in, hidden_size)
    params["w2_1"], params["b2_1"] = linear(keys[1], hidden_size, hidden_size)
    params["w3_1"], params["b3_1"] = linear(keys[2], hidden_size, 1)
    params["w1_2"], params["b1_2"] = linear(keys[3], d_in, hidden_size)
    params["w2_2"], params["b2_2"] = linear(keys[4], hidden_size, hidden_size)
    params["w3_2"], params["b3_2"] = linear(keys[5], hidden_size, 1)
    return params


def pack_critic_params(params, num_inputs):
    """One-time packing of the twin heads into merged / block-diagonal f32 weights."""
    H = params["w1_1"].shape[1]

    # Layer 1: heads side by side, then split along the contraction dim
    # (state rows vs. action rows) so the kernel needs no concat.
    w1 = jnp.concatenate([params["w1_1"], params["w1_2"]], axis=1)  # (d_in, 2H)
    w1s = w1[:num_inputs]
    w1a = w1[num_inputs:]

    # Layer 2: block-diagonal (2H, 2H).
    zHH = jnp.zeros((H, H), jnp.float32)
    w2 = jnp.block([[params["w2_1"], zHH],
                    [zHH, params["w2_2"]]])

    # Layer 3: block-diagonal (2H, 2).
    zH1 = jnp.zeros((H, 1), jnp.float32)
    w3 = jnp.block([[params["w3_1"], zH1],
                    [zH1, params["w3_2"]]])

    # All biases in a single f32 array: row0 = b1, row1 = b2, row2 = [b3_1, b3_2, 0...].
    b1 = jnp.concatenate([params["b1_1"], params["b1_2"]], axis=1)  # (1, 2H)
    b2 = jnp.concatenate([params["b2_1"], params["b2_2"]], axis=1)  # (1, 2H)
    b3 = jnp.concatenate([params["b3_1"], params["b3_2"]], axis=1)  # (1, 2)
    b3 = jnp.pad(b3, ((0, 0), (0, 2 * H - 2)))
    b = jnp.concatenate([b1, b2, b3], axis=0)                       # (3, 2H)

    return {"w1s": w1s.astype(jnp.float32), "w1a": w1a.astype(jnp.float32),
            "w2": w2.astype(jnp.float32), "w3": w3.astype(jnp.float32),
            "b": b.astype(jnp.float32)}


def critic_forward_ref(state, action, params):
    """Pure-JAX reference with the original module's f32 math."""
    xu = jnp.concatenate([state, action], axis=1).astype(jnp.float32)

    def head(sfx):
        h = jnp.maximum(
            jnp.dot(xu, params[f"w1_{sfx}"], precision="highest") + params[f"b1_{sfx}"], 0.0)
        h = jnp.maximum(
            jnp.dot(h, params[f"w2_{sfx}"], precision="highest") + params[f"b2_{sfx}"], 0.0)
        return jnp.dot(h, params[f"w3_{sfx}"], precision="highest") + params[f"b3_{sfx}"]

    return head("1"), head("2")


if __name__ == "__main__":
    # HalfCheetah-like small shapes: obs dim 17, action dim 6, batch 8, hidden 32.
    batch = 8
    num_inputs = 17
    num_actions = 6
    hidden_size = 32

    root = jax.random.PRNGKey(0)
    k_state, k_action, k_params = jax.random.split(root, 3)

    state = jax.random.normal(k_state, (batch, num_inputs), jnp.float32)
    action = jax.random.normal(k_action, (batch, num_actions), jnp.float32)
    params = init_critic_params(k_params, num_inputs, num_actions, hidden_size)
    packed = pack_critic_params(params, num_inputs)

    q1, q2 = critic_forward(state, action, packed)
    jax.block_until_ready((q1, q2))

    q1_ref, q2_ref = critic_forward_ref(state, action, params)

    assert q1.shape == (batch, 1) and q2.shape == (batch, 1)
    assert jnp.allclose(q1, q1_ref, atol=5e-3, rtol=5e-3), \
        f"q1 mismatch: max abs err {jnp.max(jnp.abs(q1 - q1_ref))}"
    assert jnp.allclose(q2, q2_ref, atol=5e-3, rtol=5e-3), \
        f"q2 mismatch: max abs err {jnp.max(jnp.abs(q2 - q2_ref))}"

    print("KERNEL_OK")
</pallas_src>

<mosaic_0001>
module attributes {stable_mosaic.version = 11 : i64} {
  func.func @_critic_kernel(%arg0: memref<8x17xf32, #tpu.memory_space<vmem>>, %arg1: memref<8x6xf32, #tpu.memory_space<vmem>>, %arg2: memref<17x64xf32, #tpu.memory_space<vmem>>, %arg3: memref<6x64xf32, #tpu.memory_space<vmem>>, %arg4: memref<64x64xf32, #tpu.memory_space<vmem>>, %arg5: memref<64x2xf32, #tpu.memory_space<vmem>>, %arg6: memref<3x64xf32, #tpu.memory_space<vmem>>, %arg7: memref<8x2xf32, #tpu.memory_space<vmem>>) attributes {dimension_semantics = [], scalar_prefetch = 0 : i64, scratch_operands = 0 : i64, tpu.core_type = #tpu.core_type<tc>} {
    %c0 = arith.constant 0 : index
    %c0_0 = arith.constant 0 : index
    %0 = vector.load %arg0[%c0, %c0_0] : memref<8x17xf32, #tpu.memory_space<vmem>>, vector<8x17xf32>
    %c0_1 = arith.constant 0 : index
    %c0_2 = arith.constant 0 : index
    %1 = vector.load %arg2[%c0_1, %c0_2] : memref<17x64xf32, #tpu.memory_space<vmem>>, vector<17x64xf32>
    %cst = arith.constant dense<0.000000e+00> : vector<8x64xf32>
    %2 = tpu.matmul %0, %1, %cst {dimension_numbers = #tpu.dot_dimension_numbers<[1], [0], [0], [1], [0, 0, 1, 1], [], []>} : vector<8x17xf32>, vector<17x64xf32>, vector<8x64xf32> -> vector<8x64xf32>
    %c0_3 = arith.constant 0 : index
    %c0_4 = arith.constant 0 : index
    %3 = vector.load %arg1[%c0_3, %c0_4] : memref<8x6xf32, #tpu.memory_space<vmem>>, vector<8x6xf32>
    %c0_5 = arith.constant 0 : index
    %c0_6 = arith.constant 0 : index
    %4 = vector.load %arg3[%c0_5, %c0_6] : memref<6x64xf32, #tpu.memory_space<vmem>>, vector<6x64xf32>
    %cst_7 = arith.constant dense<0.000000e+00> : vector<8x64xf32>
    %5 = tpu.matmul %3, %4, %cst_7 {dimension_numbers = #tpu.dot_dimension_numbers<[1], [0], [0], [1], [0, 0, 1, 1], [], []>} : vector<8x6xf32>, vector<6x64xf32>, vector<8x64xf32> -> vector<8x64xf32>
    %6 = arith.addf %2, %5 : vector<8x64xf32>
    %c0_8 = arith.constant 0 : index
    %c0_9 = arith.constant 0 : index
    %7 = vector.load %arg6[%c0_8, %c0_9] : memref<3x64xf32, #tpu.memory_space<vmem>>, vector<1x64xf32>
    %8 = vector.broadcast %7 : vector<1x64xf32> to vector<8x64xf32>
    %9 = arith.addf %6, %8 : vector<8x64xf32>
    %cst_10 = arith.constant 0.000000e+00 : f32
    %10 = vector.broadcast %cst_10 : f32 to vector<8x64xf32>
    %11 = arith.maximumf %9, %10 : vector<8x64xf32>
    %c0_11 = arith.constant 0 : index
    %c0_12 = arith.constant 0 : index
    %12 = vector.load %arg4[%c0_11, %c0_12] : memref<64x64xf32, #tpu.memory_space<vmem>>, vector<64x64xf32>
    %cst_13 = arith.constant dense<0.000000e+00> : vector<8x64xf32>
    %13 = tpu.matmul %11, %12, %cst_13 {dimension_numbers = #tpu.dot_dimension_numbers<[1], [0], [0], [1], [0, 0, 1, 1], [], []>} : vector<8x64xf32>, vector<64x64xf32>, vector<8x64xf32> -> vector<8x64xf32>
    %c1 = arith.constant 1 : index
    %c0_14 = arith.constant 0 : index
    %14 = vector.load %arg6[%c1, %c0_14] : memref<3x64xf32, #tpu.memory_space<vmem>>, vector<1x64xf32>
    %15 = vector.broadcast %14 : vector<1x64xf32> to vector<8x64xf32>
    %16 = arith.addf %13, %15 : vector<8x64xf32>
    %cst_15 = arith.constant 0.000000e+00 : f32
    %17 = vector.broadcast %cst_15 : f32 to vector<8x64xf32>
    %18 = arith.maximumf %16, %17 : vector<8x64xf32>
    %c0_16 = arith.constant 0 : index
    %c0_17 = arith.constant 0 : index
    %19 = vector.load %arg5[%c0_16, %c0_17] : memref<64x2xf32, #tpu.memory_space<vmem>>, vector<64x2xf32>
    %cst_18 = arith.constant dense<0.000000e+00> : vector<8x2xf32>
    %20 = tpu.matmul %18, %19, %cst_18 {dimension_numbers = #tpu.dot_dimension_numbers<[1], [0], [0], [1], [0, 0, 1, 1], [], []>} : vector<8x64xf32>, vector<64x2xf32>, vector<8x2xf32> -> vector<8x2xf32>
    %c2 = arith.constant 2 : index
    %c0_19 = arith.constant 0 : index
    %21 = vector.load %arg6[%c2, %c0_19] : memref<3x64xf32, #tpu.memory_space<vmem>>, vector<1x2xf32>
    %22 = vector.broadcast %21 : vector<1x2xf32> to vector<8x2xf32>
    %23 = arith.addf %20, %22 : vector<8x2xf32>
    %c0_20 = arith.constant 0 : index
    %c0_21 = arith.constant 0 : index
    %24 = vector.load %arg7[%c0_20, %c0_21] : memref<8x2xf32, #tpu.memory_space<vmem>>, vector<8x2xf32>
    tpu.vector_store %arg7[%c0_20, %c0_21], %23 {strides = array<i32>} : memref<8x2xf32, #tpu.memory_space<vmem>>, vector<8x2xf32>,
    return
  }
}

</mosaic_0001>

<bundles_post_ra>
// kernel: critic_forward.1
= control target key start
LH: loop header
LB: loop body
LE: loop exit
PB: predicated region body
PF: predicated region fallthrough
CT: control target
= control target key end

     0   :  { %12 = vsyncpa [#allocation3], 0  ;;  %s494_s0 = inlined_call_operand.hbm [shape: f32[8,17], index: 0, kind: input, shape index: {}]   ;;  %s495_s1 = inlined_call_operand.hbm [shape: f32[8,6], index: 1, kind: input, shape index: {}]   ;;  %s496_s2 = inlined_call_operand.hbm [shape: f32[17,64], index: 2, kind: input, shape index: {}]   ;;  %s497_s3 = inlined_call_operand.hbm [shape: f32[6,64], index: 3, kind: input, shape index: {}]   ;;  %s498_s4 = inlined_call_operand.vmem [shape: f32[64,64], index: 4, kind: input, shape index: {}]   ;;  %s499_s5 = inlined_call_operand.vmem [shape: f32[64,2], index: 5, kind: input, shape index: {}]   ;;  %s500_s6 = inlined_call_operand.hbm [shape: f32[3,64], index: 6, kind: input, shape index: {}]   ;;  %s501_s7 = inlined_call_operand.vmem [shape: f32[8,2], index: 7, kind: output, shape index: {}]  }
   0x1   :  { %13 = vsyncpa [#allocation5], 0  ;;  %s31_s26 = sshll.u32 %s495_s1, 4  ;;  %s32_s26 = int_to_ptr.hbm [resolvable:$true] %s31_s26 }
   0x2   :  { %14 = vsyncpa [#allocation8], 0  ;;  %s381_s27 = smov [#allocation4]   ;;  %s55_s8 = sshll.u32 %s497_s3, 4  ;;  %s56_s8 = int_to_ptr.hbm [resolvable:$true] %s55_s8 }
   0x3   :  { %s33_s28 = sshll.u32 %s381_s27, 4  ;;  %s382_s9 = smov [#allocation7]   ;;  %s34_s28 = int_to_ptr.vmem [resolvable:$true] %s33_s28 }
   0x4   :  { %36 = dma.hbm_to_vmem [thread:$0]  %s32_s26, 128, %s34_s28, [#allocation5]  }
   0x5   :  { %s57_s10 = sshll.u32 %s382_s9, 4  ;;  %s20_s13 = sshll.u32 %s494_s0, 4  ;;  %s58_s10 = int_to_ptr.vmem [resolvable:$true] %s57_s10  ;;  %s21_s13 = int_to_ptr.hbm [resolvable:$true] %s20_s13 }
   0x6   :  { %60 = dma.hbm_to_vmem [thread:$0]  %s56_s8, 128, %s58_s10, [#allocation8]  }
   0x7   :  { %s41_s15 = sshll.u32 %s496_s2, 4  ;;  %s383_s16 = smov [#allocation2]   ;;  %s42_s15 = int_to_ptr.hbm [resolvable:$true] %s41_s15 }
   0x8   :  { %s22_s17 = sshll.u32 %s383_s16, 4  ;;  %s384_s3 = smov [#allocation6]   ;;  %s23_s17 = int_to_ptr.vmem [resolvable:$true] %s22_s17 }
   0x9   :  { %25 = dma.hbm_to_vmem [thread:$0]  %s21_s13, 128, %s23_s17, [#allocation3]  }
   0xa   :  { %s43_s18 = sshll.u32 %s384_s3, 4  ;;  %s385_s19 = smov 128   ;;  %s44_s18 = int_to_ptr.vmem [resolvable:$true] %s43_s18 }
   0xb   :  { %s386_s20 = smov 8   ;;  %s70_s22 = sshll.u32 %s500_s6, 4  ;;  %s71_s22 = int_to_ptr.hbm [resolvable:$true] %s70_s22 }
   0xc   :  { %49 = dma.hbm_to_vmem [thread:$0]  %s42_s15, 384, %s44_s18, [#allocation5], %s385_s19, %s385_s19, %s386_s20  }
   0xd   :  { %s387_s23 = smov [#allocation9]  }
   0xe   :  { %s72_s24 = sshll.u32 %s387_s23, 4  ;;  %s73_s24 = int_to_ptr.vmem [resolvable:$true] %s72_s24 }
   0xf   :  { %75 = dma.hbm_to_vmem [thread:$0]  %s71_s22, 64, %s73_s24, [#allocation8]  }
  0x10   :  { %375 = dma.done.wait [#allocation3], 128  }
  0x11   :  { %376 = vsyncadd [#allocation3], 4294967168 }
  0x12   :  { %377 = dma.done.wait [#allocation5], 512  }
  0x13   :  { %378 = vsyncadd [#allocation5], 4294966784 }
  0x14   :  { %379 = dma.done.wait [#allocation8], 192  }
  0x15   :  { %380 = vsyncadd [#allocation8], 4294967104  ;;  %vm134_vm0 = vcmask 1040384   ;;  %vm106_vm1 = vcmask 1045504   ;;  %vm102_vm2 = vcmask 48128   ;;  %v98_v1 = vld [vmem:[#allocation6 + $0x8] sm:$0xff] }
  0x16   :  { %v99_v0 = vld [vmem:[#allocation6 + $0x10] sm:$0x1]  ;;  %v101_v2 = vld [vmem:[#allocation7] sm:$0x3f]  ;;  %v97_v4 = vld [vmem:[#allocation6] sm:$0xff]  ;;  %vm130_vm3 = vcmask 138240  }
  0x17   :  { %241 = vmatpush.msk.msra.mxu1 %vm134_vm0, %v99_v0  ;;  %239 = vmatpush.msk.msra.mxu0 %vm106_vm1, %v101_v2  ;;  %v100_v3 = vld [vmem:[#allocation4] sm:$0xff]  ;;  %v169_v5 = vld [vmem:[%s498_s4 + $0x38] sm:$0xff]  ;;  %v168_v6 = vld [vmem:[%s498_s4 + $0x30] sm:$0xff]  ;;  %vm172_vm4 = vcmask 523264   ;;  %vm230_vm5 = vcmask 15360  }
  0x18   :  { %240 = vmatmul.msk.f32.vlgmr.msra.gmra.mxu0 %vm102_vm2, %v100_v3  ;;  %v96_v7 = vld [vmem:[#allocation2] sm:$0xff]  ;;  %184 = vmatpush.msra.mxu2 %v169_v5  ;;  %v167_v8 = vld [vmem:[%s498_s4 + $0x28] sm:$0xff]  ;;  %v165_v10 = vld [vmem:[%s498_s4 + $0x18] sm:$0xff] }
  0x19   :  { %152 = vmatpush.msra.mxu1 %v98_v1  ;;  %v166_v9 = vld [vmem:[%s498_s4 + $0x20] sm:$0xff]  ;;  %v164_v11 = vld [vmem:[%s498_s4 + $0x10] sm:$0xff]  ;;  %v163_v12 = vld [vmem:[%s498_s4 + $0x8] sm:$0xff] }
  0x1a   :  { %185 = vmatpush.msra.mxu2 %v168_v6  ;;  %v162_v13 = vld [vmem:[%s498_s4] sm:$0xff]  ;;  %v204_v14 = vld [vmem:[%s499_s5 + $0x38] sm:$0xff]  ;;  %v203_v15 = vld [vmem:[%s499_s5 + $0x30] sm:$0xff] }
  0x1b   :  { %153 = vmatpush.msra.mxu1 %v97_v4  ;;  %218 = vmatpush.msra.mxu3 %v204_v14  ;;  %v202_v16 = vld [vmem:[%s499_s5 + $0x28] sm:$0xff]  ;;  %v201_v17 = vld [vmem:[%s499_s5 + $0x20] sm:$0xff]  ;;  %v200_v18 = vld [vmem:[%s499_s5 + $0x18] sm:$0xff] }
  0x1c   :  { %242 = vmatmul.msk.f32.vlgmr.msra.gmra.mxu1 %vm130_vm3, %v96_v7  ;;  %186 = vmatpush.msra.mxu2 %v167_v8  ;;  %v252_v20 = vld [vmem:[#allocation9] ss:$0 sm:$0xff]  ;;  %v198_v26 = vld [vmem:[%s499_s5 + $0x8] sm:$0xff]  ;;  %v197_v27 = vld [vmem:[%s499_s5] sm:$0xff] }
  0x1d   :  { %219 = vmatpush.msra.mxu3 %v203_v15  ;;  %v199_v25 = vld [vmem:[%s499_s5 + $0x10] sm:$0xff] }
  0x1e   :  { %187 = vmatpush.msra.mxu2 %v166_v9  ;;  %v253_v28 = vld [vmem:[#allocation9 + $0x1] ss:$0 sm:$0xff]  ;;  %v254_v32 = vld [vmem:[#allocation9 + $0x2] ss:$0 sm:$0xff] }
  0x1f   :  { %220 = vmatpush.msra.mxu3 %v202_v16 }
  0x20   :  { %188 = vmatpush.msra.mxu2 %v165_v10 }
  0x21   :  { %221 = vmatpush.msra.mxu3 %v201_v17 }
  0x22   :  { %189 = vmatpush.msra.mxu2 %v164_v11 }
  0x23   :  { %222 = vmatpush.msra.mxu3 %v200_v18 }
  0x24   :  { %190 = vmatpush.msra.mxu2 %v163_v12 }
  0x25   :  { %223 = vmatpush.msra.mxu3 %v199_v25 }
  0x26   :  { %191 = vmatpush.msra.mxu2 %v162_v13 }
  0x27   :  { %224 = vmatpush.msra.mxu3 %v198_v26 }
  0x29   :  { %225 = vmatpush.msra.mxu3 %v197_v27 }
  0x95   :  { %v127_v19 = vpop.f32.mrf.mxu0 }
  0x99   :  { %v155_v21 = vpop.f32.mrf.mxu1 }
  0x9a   :  { %v156_v22 = vadd.f32 %v155_v21, %v127_v19 }
  0x9c   :  { %v160_v23 = vadd.f32 %v252_v20, %v156_v22 }
  0x9e   :  { %v161_v24 = vmax.f32 %v160_v23, 0.0 }
  0xa0   :  { %243 = vmatmul.msk.f32.vlgmr.msra.gmra.mxu2 %vm172_vm4, %v161_v24 }
 0x123   :  { %v193_v29 = vpop.f32.mrf.mxu2 }
 0x124   :  { %v194_v30 = vadd.f32 %v253_v28, %v193_v29 }
 0x126   :  { %v196_v31 = vmax.f32 %v194_v30, 0.0 }
 0x128   :  { %244 = vmatmul.msk.f32.vlgmr.msra.gmra.mxu3 %vm172_vm4, %v196_v31 }
 0x1ab   :  { %v227_v33 = vpop.f32.mrf.mxu3 }
 0x1ac   :  { %v228_v34 = vadd.f32 %v254_v32, %v227_v33 }
 0x1ae   :  { %231 = vst.msk [vmem:[%s501_s7] sm:$0xff] %vm230_vm5, %v228_v34 }
 0x1af   :  { %236 = vsyncpa [#allocation3], 1 }
 0x1b0   :  { %237 = vsyncpa [#allocation5], 1 }
 0x1b1   :  { %238 = vsyncpa [#allocation8], 1 }

</bundles_post_ra>
